<compile_context>
chip_gen: v6e
topology: v6e:2x2x1
jax: 0.10.0
libtpu: 0.0.40
codegen_flags: <defaults>
</compile_context>

<pallas_src>
import math

import jax
import jax.numpy as jnp
from jax.experimental import pallas as pl
from jax.experimental.pallas import tpu as pltpu


def _cdiv(a: int, b: int) -> int:
    return -(-a // b)


def _round_up(a: int, b: int) -> int:
    return _cdiv(a, b) * b


def _pos_emb_kernel(x_ref, w_ref, m_ref, o_ref):
    # x_ref: (TB, k)       -- k packed positions per row
    # w_ref: (k, k*dim)    -- row j holds [w, w] in group j's lane block, else 0
    # m_ref: (1, k*dim)    -- 1.0 on cos lanes, 0.0 on sin lanes
    # o_ref: (TB, k*dim)   -- lane-dense packed embeddings
    x = x_ref[...].astype(jnp.float32)                      # (TB, k)
    w = w_ref[...]                                          # (k, k*dim)

    k = x.shape[1]
    # Packed outer product via VPU broadcast multiply-accumulate (no MXU):
    # xw[b, c] = x[b, c//dim] * w[c % dim (mod half)]
    xw = x[:, 0:1] * w[0:1, :]                              # (TB, k*dim)
    for j in range(1, k):                                   # k is small & static
        xw = xw + x[:, j:j + 1] * w[j:j + 1, :]

    # Same op order as torch: einsum first, then * 2*pi.
    freq = xw * jnp.float32(2.0 * math.pi)

    s = jnp.sin(freq)                                       # EUP, full 128 lanes
    c = jnp.cos(freq)
    # Single lane-dense, unmasked full-tile store.
    o_ref[...] = jnp.where(m_ref[...] != 0.0, c, s).astype(o_ref.dtype)


def learned_sinusoidal_pos_emb(x, weights, *, max_block_rows=4096):
    """x: (B,), weights: (dim//2,) -> (B, dim) f32."""
    assert x.ndim == 1 and weights.ndim == 1
    B = int(x.shape[0])
    half = int(weights.shape[0])
    dim = 2 * half

    # Pack k consecutive positions per output row so the lane axis is
    # (near-)128-dense.  For dim >= 128 no packing is needed (k = 1).
    k = max(1, min(128 // dim, 16)) if dim <= 128 else 1
    kd = k * dim

    # Packed rows; tile-row count is a multiple of 8 (sublane rule) and capped
    # so the double-buffered output block stays ~4 MiB total (v7x-safe VMEM).
    rows = _cdiv(B, k)
    bytes_per_row = kd * 4
    tb_cap = max(8, ((2 * 1024 * 1024) // bytes_per_row) // 8 * 8)
    tb = min(max_block_rows, tb_cap, _round_up(rows, 8))
    rows_pad = _cdiv(rows, tb) * tb
    grid = (rows_pad // tb,)

    # Pack x -> (rows_pad, k); padded tail positions are zero and sliced off.
    x_flat = jnp.pad(x, (0, rows_pad * k - B))
    x2 = x_flat.reshape(rows_pad, k)

    # (k, k*dim) selection*weight matrix: row j = [w, w] in group j's lanes.
    w_f32 = weights.astype(jnp.float32)
    w_tiled = jnp.concatenate([w_f32, w_f32])[None, :]              # (1, dim)
    wrow = jnp.kron(jnp.eye(k, dtype=jnp.float32), w_tiled)         # (k, k*dim)

    # (1, k*dim) mask: 1.0 where the lane belongs to the cos half of its group.
    cos_mask = ((jnp.arange(kd) % dim) >= half).astype(jnp.float32)[None, :]

    out = pl.pallas_call(
        _pos_emb_kernel,
        out_shape=jax.ShapeDtypeStruct((rows_pad, kd), jnp.float32),
        grid=grid,
        in_specs=[
            pl.BlockSpec((tb, k), lambda i: (i, 0)),     # packed positions
            pl.BlockSpec((k, kd), lambda i: (0, 0)),     # weight rows (resident)
            pl.BlockSpec((1, kd), lambda i: (0, 0)),     # cos mask (resident)
        ],
        out_specs=pl.BlockSpec((tb, kd), lambda i: (i, 0)),
        compiler_params=pltpu.CompilerParams(
            dimension_semantics=("parallel",),
        ),
    )(x2, wrow, cos_mask)

    # (rows_pad, k*dim) -> (rows_pad*k, dim) is a trivial row-major reshape:
    # group j of packed row i is exactly position i*k + j.
    return out.reshape(rows_pad * k, dim)[:B]


if __name__ == "__main__":
    key = jax.random.PRNGKey(0)
    k_w, k_x = jax.random.split(key)

    dim = 32                      # must be even (dim % 2 == 0)
    B = 8

    # deterministic "learned" parameter (torch.randn equivalent)
    weights = jax.random.normal(k_w, (dim // 2,), dtype=jnp.float32)
    # scalar positions / timesteps
    x = jax.random.uniform(k_x, (B,), dtype=jnp.float32) * 10.0

    out = jax.block_until_ready(learned_sinusoidal_pos_emb(x, weights))

    # reference check in plain JAX (torch ordering: einsum then * 2*pi)
    freq_ref = (x[:, None] * weights[None, :]) * (2.0 * math.pi)
    ref = jnp.concatenate([jnp.sin(freq_ref), jnp.cos(freq_ref)], axis=-1)

    assert out.shape == (B, dim)
    assert out.dtype == jnp.float32
    max_err = float(jnp.max(jnp.abs(out - ref)))
    assert jnp.allclose(out, ref, atol=1e-4, rtol=1e-5), max_err

    print("KERNEL_OK")
</pallas_src>

<mosaic_0001>
module attributes {stable_mosaic.version = 11 : i64} {
  func.func @_pos_emb_kernel(%arg0: i32, %arg1: memref<8x4xf32, #tpu.memory_space<vmem>>, %arg2: memref<4x128xf32, #tpu.memory_space<vmem>>, %arg3: memref<1x128xf32, #tpu.memory_space<vmem>>, %arg4: memref<8x128xf32, #tpu.memory_space<vmem>>) attributes {dimension_semantics = [#tpu.dimension_semantics<parallel>], iteration_bounds = array<i64: 1>, scalar_prefetch = 0 : i64, scratch_operands = 0 : i64, tpu.core_type = #tpu.core_type<tc>, window_params = [{transform_indices = @transform_0, window_bounds = array<i64: 8, 4>}, {pipeline_mode = #tpu.pipeline_mode<synchronous>, transform_indices = @transform_1, window_bounds = array<i64: 4, 128>}, {pipeline_mode = #tpu.pipeline_mode<synchronous>, transform_indices = @transform_2, window_bounds = array<i64: 1, 128>}, {transform_indices = @transform_3, window_bounds = array<i64: 8, 128>}]} {
    %c0 = arith.constant 0 : index
    %c0_0 = arith.constant 0 : index
    %0 = vector.load %arg1[%c0, %c0_0] : memref<8x4xf32, #tpu.memory_space<vmem>>, vector<8x4xf32>
    %c0_1 = arith.constant 0 : index
    %c0_2 = arith.constant 0 : index
    %1 = vector.load %arg2[%c0_1, %c0_2] : memref<4x128xf32, #tpu.memory_space<vmem>>, vector<4x128xf32>
    %2 = vector.extract_strided_slice %0 {offsets = [0, 0], sizes = [8, 1], strides = [1, 1]} : vector<8x4xf32> to vector<8x1xf32>
    %3 = vector.extract_strided_slice %1 {offsets = [0, 0], sizes = [1, 128], strides = [1, 1]} : vector<4x128xf32> to vector<1x128xf32>
    %4 = vector.broadcast %2 : vector<8x1xf32> to vector<8x128xf32>
    %5 = vector.broadcast %3 : vector<1x128xf32> to vector<8x128xf32>
    %6 = arith.mulf %4, %5 : vector<8x128xf32>
    %7 = vector.extract_strided_slice %0 {offsets = [0, 1], sizes = [8, 1], strides = [1, 1]} : vector<8x4xf32> to vector<8x1xf32>
    %8 = vector.extract_strided_slice %1 {offsets = [1, 0], sizes = [1, 128], strides = [1, 1]} : vector<4x128xf32> to vector<1x128xf32>
    %9 = vector.broadcast %7 : vector<8x1xf32> to vector<8x128xf32>
    %10 = vector.broadcast %8 : vector<1x128xf32> to vector<8x128xf32>
    %11 = arith.mulf %9, %10 : vector<8x128xf32>
    %12 = arith.addf %6, %11 : vector<8x128xf32>
    %13 = vector.extract_strided_slice %0 {offsets = [0, 2], sizes = [8, 1], strides = [1, 1]} : vector<8x4xf32> to vector<8x1xf32>
    %14 = vector.extract_strided_slice %1 {offsets = [2, 0], sizes = [1, 128], strides = [1, 1]} : vector<4x128xf32> to vector<1x128xf32>
    %15 = vector.broadcast %13 : vector<8x1xf32> to vector<8x128xf32>
    %16 = vector.broadcast %14 : vector<1x128xf32> to vector<8x128xf32>
    %17 = arith.mulf %15, %16 : vector<8x128xf32>
    %18 = arith.addf %12, %17 : vector<8x128xf32>
    %19 = vector.extract_strided_slice %0 {offsets = [0, 3], sizes = [8, 1], strides = [1, 1]} : vector<8x4xf32> to vector<8x1xf32>
    %20 = vector.extract_strided_slice %1 {offsets = [3, 0], sizes = [1, 128], strides = [1, 1]} : vector<4x128xf32> to vector<1x128xf32>
    %21 = vector.broadcast %19 : vector<8x1xf32> to vector<8x128xf32>
    %22 = vector.broadcast %20 : vector<1x128xf32> to vector<8x128xf32>
    %23 = arith.mulf %21, %22 : vector<8x128xf32>
    %24 = arith.addf %18, %23 : vector<8x128xf32>
    %cst = arith.constant 6.28318548 : f32
    %25 = vector.broadcast %cst : f32 to vector<8x128xf32>
    %26 = arith.mulf %24, %25 : vector<8x128xf32>
    %27 = math.sin %26 : vector<8x128xf32>
    %28 = math.cos %26 : vector<8x128xf32>
    %c0_3 = arith.constant 0 : index
    %c0_4 = arith.constant 0 : index
    %29 = vector.load %arg3[%c0_3, %c0_4] : memref<1x128xf32, #tpu.memory_space<vmem>>, vector<1x128xf32>
    %cst_5 = arith.constant 0.000000e+00 : f32
    %30 = vector.broadcast %cst_5 : f32 to vector<1x128xf32>
    %31 = arith.cmpf one, %29, %30 : vector<1x128xf32>
    %32 = vector.shape_cast %31 : vector<1x128xi1> to vector<1x128xi1>
    %33 = vector.broadcast %32 : vector<1x128xi1> to vector<8x128xi1>
    %34 = arith.select %33, %28, %27 : vector<8x128xi1>, vector<8x128xf32>
    %c0_6 = arith.constant 0 : index
    %c0_7 = arith.constant 0 : index
    %35 = vector.load %arg4[%c0_6, %c0_7] : memref<8x128xf32, #tpu.memory_space<vmem>>, vector<8x128xf32>
    tpu.vector_store %arg4[%c0_6, %c0_7], %34 {strides = array<i32>} : memref<8x128xf32, #tpu.memory_space<vmem>>, vector<8x128xf32>,
    return
  }
  func.func @transform_0(%arg0: i32) -> (i32, i32) {
    %c0_i32 = arith.constant 0 : i32
    %c0_i32_0 = arith.constant 0 : i32
    return %arg0, %c0_i32 : i32, i32
  }
  func.func @transform_1(%arg0: i32) -> (i32, i32) {
    %c0_i32 = arith.constant 0 : i32
    %c0_i32_0 = arith.constant 0 : i32
    %c0_i32_1 = arith.constant 0 : i32
    return %c0_i32, %c0_i32_0 : i32, i32
  }
  func.func @transform_2(%arg0: i32) -> (i32, i32) {
    %c0_i32 = arith.constant 0 : i32
    %c0_i32_0 = arith.constant 0 : i32
    %c0_i32_1 = arith.constant 0 : i32
    return %c0_i32, %c0_i32_0 : i32, i32
  }
  func.func @transform_3(%arg0: i32) -> (i32, i32) {
    %c0_i32 = arith.constant 0 : i32
    %c0_i32_0 = arith.constant 0 : i32
    return %arg0, %c0_i32 : i32, i32
  }
}

</mosaic_0001>

<bundles_post_ra>
// kernel: tpu_custom_call.1
= control target key start
LH: loop header
LB: loop body
LE: loop exit
PB: predicated region body
PF: predicated region fallthrough
CT: control target
= control target key end

     0   :  { %v22_v0 = vlaneseq  ;;  %v343_v3 = vmov 0   ;;  %v344_v4 = vmov 2   ;;  %s412_s0 = inlined_call_operand.vmem [shape: f32[8,4], index: 0, kind: input, shape index: {}]   ;;  %s413_s1 = inlined_call_operand.vmem [shape: f32[4,128], index: 1, kind: input, shape index: {}]   ;;  %s414_s2 = inlined_call_operand.vmem [shape: f32[1,128], index: 2, kind: input, shape index: {}]   ;;  %s415_s3 = inlined_call_operand.hbm [shape: f32[8,128], index: 3, kind: output, shape index: {}]  }
   0x1   :  { %v265_v1 = vld [vmem:[%s414_s2] sm:$0x1]  ;;  %312 = vset.pattern.permute.xlu0 %v343_v3  ;;  %314 = vset.pattern.permute.xlu1 %v344_v4 }
   0x2   :  { %v15_v2 = vld [vmem:[%s412_s0] sm:$0xff]  ;;  %vm266_vm0 = vcmp.ne.f32.partialorder %v265_v1, 0.0 }
   0x3   :  { %8 = vsyncpa [#allocation3], 0  ;;  %v23_v5 = vshrl.u32 %v22_v0, 7  ;;  %19 = vperm.xlu0 %312, %v15_v2   ;;  %38 = vperm.xlu1 %314, %v15_v2   ;;  %v267_v6 = vsel %vm266_vm0, 1, %v343_v3  ;;  %v345_v9 = vmov 1   ;;  %v346_v10 = vmov 3  }
   0x4   :  { %v16_v12 = vld [vmem:[%s413_s1] sm:$0xf]  ;;  %v347_v41 = vmov 683565275   ;;  %v348_v43 = vmov 2475754826  }
   0x5   :  { %v24_v7 = vsub.s32 0, %v23_v5  ;;  %v33_v11 = vsub.s32 1, %v23_v5  ;;  %v43_v14 = vsub.s32 2, %v23_v5  ;;  %v53_v16 = vsub.s32 3, %v23_v5  ;;  %s353_s1 = smov [#allocation2]  }
   0x6   :  { %v349_v46 = vmov 2131351028   ;;  %v350_v49 = vmov 2102212464   ;;  %v351_v52 = vmov 920167782  }
   0x7   :  { %v380_v8 = vrot.slane %v267_v6, %v24_v7  ;;  %313 = vset.pattern.permute.xlu0 %v345_v9  ;;  %315 = vset.pattern.permute.xlu1 %v346_v10  ;;  %v25_v17 = vrot.slane %v16_v12, %v24_v7  ;;  %v34_v18 = vrot.slane %v16_v12, %v33_v11  ;;  %v352_v55 = vmov 1326507024   ;;  %s281_s16 = sshll.u32 %s353_s1, 4  ;;  %s282_s16 = int_to_ptr.vmem [resolvable:$true] %s281_s16 }
   0x8   :  { %28 = vperm.xlu0 %313, %v15_v2   ;;  %48 = vperm.xlu1 %315, %v15_v2   ;;  %v44_v19 = vrot.slane %v16_v12, %v43_v14  ;;  %v54_v20 = vrot.slane %v16_v12, %v53_v16  ;;  %s321_s17 = scalar_lea.vmem %s282_s16, 128  ;;  %p326_p1 = scmp.lt.s32.totalorder %s282_s16, %s282_s16 }
   0x9   :  { %vm272_vm10 = vcmp.eq.s32.totalorder %v380_v8, 1  ;;  %p322_p0 = scmp.ne.s32.totalorder %s282_s16, %s321_s17  ;;  %p327_p2 = scmp.lt.s32.totalorder %s321_s17, %s321_s17 }
   0xb   :  { %p328_p3 = por %p327_p2, %p326_p1 }
   0xc   :  { %316 = vset.pattern.permute.xlu0 %v346_v10 }
   0xd   :  { %p329_p4 = pnand %p328_p3, %p322_p0 }
  0x7e   :  { %v20_v13 = vpop.permute.xlu0 %19  ;;  %v39_v15 = vpop.permute.xlu1 %38 }
  0x7f   :  { %v26_v23 = vmul.f32 %v25_v17, %v20_v13  ;;  %v45_v25 = vmul.f32 %v44_v19, %v39_v15 }
  0x83   :  { %v29_v21 = vpop.permute.xlu0 %28  ;;  %v49_v22 = vpop.permute.xlu1 %48 }
  0x84   :  { %v35_v24 = vmul.f32 %v34_v18, %v29_v21  ;;  %v55_v27 = vmul.f32 %v54_v20, %v49_v22 }
  0x86   :  { %v36_v26 = vadd.f32 %v35_v24, %v26_v23 }
  0x88   :  { %v46_v28 = vadd.f32 %v45_v25, %v36_v26 }
  0x8a   :  { %v56_v29 = vadd.f32 %v55_v27, %v46_v28 }
  0x8c   :  { %v385_v30 = vmul.f32 6.2831855, %v56_v29 }
  0x8e   :  { %v61_v31 = vand.u32 2139095040, %v385_v30  ;;  %v58_v35 = vand.u32 2147483647, %v385_v30  ;;  %vm60_vm8 = vcmp.lt.s32.totalorder %v385_v30, 0 }
  0x90   :  { %v62_v32 = vshrl.u32 %v61_v31, 23  ;;  %v65_v38 = vand.u32 8388607, %v58_v35  ;;  %vm59_vm9 = vcmp.le.f32.partialorder %v58_v35, 0.7853982 }
  0x92   :  { %v289_v33 = vadd.s32 4294967169, %v62_v32  ;;  %v66_v57 = vor.u32 8388608, %v65_v38 }
  0x94   :  { %v68_v34 = vadd.s32 1, %v289_v33  ;;  %v106_v7 = vshll.u32 %v66_v57, 8 }
  0x96   :  { %vm69_vm1 = vcmp.gt.s32.totalorder %v68_v34, 0 }
  0x97   :  { %v70_v36 = vsel %vm69_vm1, %v68_v34, 0  ;;  %vm150_vm1 = vweird.f32 %v385_v30 }
  0x98   :  { %v72_v37 = vand.u32 31, %v70_v36  ;;  %v71_v40 = vshrl.u32 %v70_v36, 5 }
  0x9a   :  { %v73_v39 = vsub.s32 32, %v72_v37  ;;  %v75_v42 = vshll.u32 %v347_v41, %v72_v37  ;;  %v78_v44 = vshll.u32 %v348_v43, %v72_v37  ;;  %v81_v48 = vshll.u32 %v349_v46, %v72_v37 }
  0x9b   :  { %v84_v51 = vshll.u32 %v350_v49, %v72_v37  ;;  %v87_v54 = vshll.u32 %v351_v52, %v72_v37  ;;  %vm90_vm2 = vcmp.lt.s32.totalorder %v71_v40, 1  ;;  %vm93_vm3 = vcmp.lt.s32.totalorder %v71_v40, 4 }
  0x9c   :  { %v76_v45 = vshrl.u32 %v348_v43, %v73_v39  ;;  %v79_v47 = vshrl.u32 %v349_v46, %v73_v39  ;;  %v82_v50 = vshrl.u32 %v350_v49, %v73_v39  ;;  %v85_v53 = vshrl.u32 %v351_v52, %v73_v39 }
  0x9d   :  { %v88_v56 = vshrl.u32 %v352_v55, %v73_v39  ;;  %v74_v2 = vshrl.u32 %v347_v41, %v73_v39  ;;  %vm92_vm4 = vcmp.lt.s32.totalorder %v71_v40, 3  ;;  %vm91_vm5 = vcmp.lt.s32.totalorder %v71_v40, 2 }
  0x9e   :  { %v77_v58 = vor.u32 %v76_v45, %v75_v42  ;;  %v80_v59 = vor.u32 %v79_v47, %v78_v44  ;;  %v83_v60 = vor.u32 %v82_v50, %v81_v48  ;;  %v86_v61 = vor.u32 %v85_v53, %v84_v51 }
  0x9f   :  { %v89_v62 = vor.u32 %v88_v56, %v87_v54 }
  0xa0   :  { %v95_v63 = vsel %vm93_vm3, %v83_v60, 2102212464  ;;  %v98_v0 = vsel %vm90_vm2, %v77_v58, %v80_v59  ;;  %v102_v1 = vsel %vm90_vm2, %v80_v59, %v83_v60  ;;  %v99_v3 = vsel %vm93_vm3, %v86_v61, 920167782 }
  0xa1   :  { %v103_v4 = vsel %vm93_vm3, %v89_v62, 1326507024  ;;  %v100_v5 = vsel %vm92_vm4, %v83_v60, %v99_v3  ;;  %v94_v9 = vsel %vm90_vm2, %v74_v2, %v77_v58  ;;  %v96_v10 = vsel %vm92_vm4, %v80_v59, %v95_v63 }
  0xa2   :  { %v104_v6 = vsel %vm92_vm4, %v86_v61, %v103_v4  ;;  %v101_v11 = vsel %vm91_vm5, %v98_v0, %v100_v5  ;;  %v97_v17 = vsel %vm91_vm5, %v94_v9, %v96_v10 }
  0xa3   :  { %v105_v12 = vsel %vm91_vm5, %v102_v1, %v104_v6  ;;  %v394_v15 = vmul.u32.u64.low %v106_v7, %v101_v11  ;;  %v395_v16 = vmul.u32.u64.high %v106_v7, %v101_v11, %v394_v15  ;;  %v113_v19 = vmul.u32 %v106_v7, %v97_v17 }
  0xa4   :  { %v391_v13 = vmul.u32.u64.low %v106_v7, %v105_v12  ;;  %v392_v14 = vmul.u32.u64.high %v106_v7, %v105_v12, %v391_v13 }
  0xa5   :  { %v116_v18 = vadd.s32 1, %v395_v16 }
  0xa6   :  { %vm115_vm6 = vc.u32 %v392_v14, %v394_v15  ;;  %v114_v32 = vadd.s32 %v394_v15, %v392_v14 }
  0xa7   :  { %v117_v20 = vsel %vm115_vm6, %v116_v18, %v395_v16 }
  0xa8   :  { %v118_v21 = vadd.s32 %v117_v20, %v113_v19 }
  0xaa   :  { %v119_v22 = vadd.s32 536870912, %v118_v21 }
  0xac   :  { %v120_v23 = vshrl.u32 %v119_v22, 30 }
  0xae   :  { %v121_v24 = vshll.u32 %v120_v23, 30  ;;  %v144_v46 = vsub.s32 4, %v120_v23 }
  0xb0   :  { %v122_v25 = vsub.s32 %v118_v21, %v121_v24  ;;  %v145_v49 = vsel %vm60_vm8, %v144_v46, %v120_v23 }
  0xb1   :  { %v147_v50 = vsel %vm59_vm9, 0, %v145_v49 }
  0xb2   :  { %v124_v26 = vsub.s32 0, %v122_v25  ;;  %v151_v51 = vadd.s32 3, %v147_v50  ;;  %v255_v53 = vand.u32 3, %v147_v50 }
  0xb4   :  { %v290_v27 = vmin.u32 %v124_v26, %v122_v25  ;;  %v152_v52 = vand.u32 3, %v151_v51  ;;  %vm260_vm12 = vcmp.eq.s32.totalorder %v255_v53, 2  ;;  %vm257_vm14 = vcmp.eq.s32.totalorder %v255_v53, 0 }
  0xb5   :  { %vm256_vm0 = vcmp.lt.s32.totalorder %v255_v53, 2 }
  0xb6   :  { %v126_v28 = vclz %v290_v27  ;;  %vm157_vm11 = vcmp.eq.s32.totalorder %v152_v52, 2  ;;  %vm154_vm13 = vcmp.eq.s32.totalorder %v152_v52, 0  ;;  %vm153_vm15 = vcmp.lt.s32.totalorder %v152_v52, 2 }
  0xb8   :  { %v291_v29 = vadd.s32 4294967294, %v126_v28 }
  0xba   :  { %vm292_vm7 = vcmp.lt.s32.totalorder %v291_v29, 0 }
  0xbb   :  { %v129_v31 = vsel %vm292_vm7, 0, %v291_v29 }
  0xbc   :  { %v130_v33 = vsub.s32 32, %v129_v31  ;;  %v134_v34 = vsub.s32 4294967266, %v129_v31  ;;  %v131_v36 = vshll.u32 %v122_v25, %v129_v31 }
  0xbe   :  { %v132_v37 = vshrl.u32 %v114_v32, %v130_v33  ;;  %v135_v38 = vadd.s32 127, %v134_v34 }
  0xc0   :  { %v133_v39 = vor.u32 %v132_v37, %v131_v36  ;;  %v136_v40 = vshll.u32 %v135_v38, 23 }
  0xc2   :  { %v137_v41 = vor.u32 4788187, %v136_v40  ;;  %v140_v43 = vcvt.s32.f32 %v133_v39 }
  0xc4   :  { %v138_v42 = vand.u32 2147483647, %v137_v41 }
  0xc6   :  { %v141_v44 = vmul.f32 %v140_v43, %v138_v42 }
  0xc8   :  { %v142_v45 = vxor.u32 2147483648, %v141_v44 }
  0xca   :  { %v143_v47 = vsel %vm60_vm8, %v142_v45, %v141_v44 }
  0xcb   :  { %v146_v48 = vsel %vm59_vm9, %v385_v30, %v143_v47 }
  0xcc   :  { %317 = vcosq.f32 %v146_v48 }
  0xcd   :  { %319 = vsinq.f32 %v146_v48 }
  0xd9   :  { %v318_v54 = vpop.eup %317 }
  0xda   :  { %v320_v55 = vpop.eup %319  ;;  %v158_v56 = vxor.u32 2147483648, %v318_v54 }
  0xdb   :  { %v155_v57 = vxor.u32 2147483648, %v320_v55 }
  0xdc   :  { %v159_v58 = vsel %vm157_vm11, %v158_v56, %v320_v55  ;;  %v262_v35 = vsel %vm260_vm12, %v158_v56, %v320_v55 }
  0xdd   :  { %v156_v59 = vsel %vm154_vm13, %v318_v54, %v155_v57  ;;  %v259_v60 = vsel %vm257_vm14, %v318_v54, %v155_v57 }
  0xde   :  { %v160_v61 = vsel %vm153_vm15, %v156_v59, %v159_v58  ;;  %v263_v62 = vsel %vm256_vm0, %v259_v60, %v262_v35 }
  0xdf   :  { %v161_v63 = vsel %vm150_vm1, nan, %v160_v61  ;;  %v264_v0 = vsel %vm150_vm1, nan, %v263_v62 }
  0xe0   :  { %v273_v1 = vsel %vm272_vm10, %v264_v0, %v161_v63 }
  0xe1   :  { %274 = vst [vmem:[#allocation2] sm:$0xff] %v273_v1 }
  0xe2   :  { %332 = shalt.err (!%p329_p4)
}
  0xe3   :  { %284 = dma.vmem_to_hbm [thread:$0]  %s282_s16, 128, %s415_s3, [#allocation3]  }
  0xe4   :  { %341 = dma.done.wait [#allocation3], 128  }
  0xe5   :  { %342 = vsyncadd [#allocation3], 4294967168 }
  0xe6   :  { %288 = vsyncpa [#allocation3], 1 }

</bundles_post_ra>
